<compile_context>
chip_gen: v7x
topology: tpu7x:2x2x1
jax: 0.10.0
libtpu: 0.0.40
codegen_flags: <defaults>
</compile_context>

<pallas_src>
import functools

import jax
import jax.numpy as jnp
from jax import lax
from jax.experimental import pallas as pl
from jax.experimental.pallas import tpu as pltpu

_LANES = 128
_SUB = 8                                  # accumulator sublanes (one f32 vreg)
_CHUNK_ROWS = 64                          # rows folded per inner step (8 f32 vregs)
_N_CORES = 2                              # leading "parallel" axis (v7x has 2 TCs)
_TARGET_BLOCK_BYTES = 8 * 1024 * 1024     # ~8 MiB input block, 16 MiB double-buffered
_VMEM_LIMIT_BYTES = 32 * 1024 * 1024      # safe on v5e/v6e/v7x


def _min_sublanes(dtype):
    """Row-group granularity for the head slab (packing-aware)."""
    itemsize = jnp.dtype(dtype).itemsize
    return {4: 8, 2: 16, 1: 32}.get(itemsize, 8)


def _stats_kernel(x_ref, acc_ref, *, rows_total, block_rows, blocks_per_core,
                  n_full_blocks, needs_masked):
    """Fold one (block_rows, 128) tile into this core's (24,128) accumulator."""
    c = pl.program_id(0)          # core (parallel)
    i = pl.program_id(1)          # block within this core (arbitrary / reduction)

    @pl.when(i == 0)
    def _():
        acc_ref[pl.ds(0, _SUB), :] = jnp.full((_SUB, _LANES), jnp.inf, jnp.float32)
        acc_ref[pl.ds(_SUB, _SUB), :] = jnp.full((_SUB, _LANES), -jnp.inf, jnp.float32)
        acc_ref[pl.ds(2 * _SUB, _SUB), :] = jnp.zeros((_SUB, _LANES), jnp.float32)

    n_full_chunks = block_rows // _CHUNK_ROWS
    tail_rows = block_rows % _CHUNK_ROWS      # only nonzero in the single-block case

    def read_acc():
        return (acc_ref[pl.ds(0, _SUB), :],
                acc_ref[pl.ds(_SUB, _SUB), :],
                acc_ref[pl.ds(2 * _SUB, _SUB), :])

    def write_acc(carry):
        mn, mx, sm = carry
        acc_ref[pl.ds(0, _SUB), :] = mn
        acc_ref[pl.ds(_SUB, _SUB), :] = mx
        acc_ref[pl.ds(2 * _SUB, _SUB), :] = sm

    def load_chunk(start, size):
        # Per-chunk cast: never materializes a full-block f32 copy in VMEM.
        xc = x_ref[pl.ds(start, size), :].astype(jnp.float32)
        return xc.reshape(-1, _SUB, _LANES)   # size is a static multiple of 8

    def fold_plain(xr, carry):
        mn, mx, sm = carry
        return (jnp.minimum(mn, jnp.min(xr, axis=0)),
                jnp.maximum(mx, jnp.max(xr, axis=0)),
                sm + jnp.sum(xr, axis=0))

    def fold_masked(xr, start, valid_rows, carry):
        mn, mx, sm = carry
        g = lax.broadcasted_iota(jnp.int32, xr.shape, 0)
        s = lax.broadcasted_iota(jnp.int32, xr.shape, 1)
        valid = (start + g * _SUB + s) < valid_rows
        return (jnp.minimum(mn, jnp.min(jnp.where(valid, xr, jnp.inf), axis=0)),
                jnp.maximum(mx, jnp.max(jnp.where(valid, xr, -jnp.inf), axis=0)),
                sm + jnp.sum(jnp.where(valid, xr, 0.0), axis=0))

    def run_plain():
        carry = read_acc()
        if n_full_chunks > 0:
            def body(ci, carry):
                start = pl.multiple_of(ci * _CHUNK_ROWS, _CHUNK_ROWS)
                return fold_plain(load_chunk(start, _CHUNK_ROWS), carry)
            carry = lax.fori_loop(0, n_full_chunks, body, carry,
                                  unroll=max(1, min(8, n_full_chunks)))
        if tail_rows > 0:
            carry = fold_plain(load_chunk(n_full_chunks * _CHUNK_ROWS, tail_rows), carry)
        write_acc(carry)

    def run_masked():
        gb = c * blocks_per_core + i
        valid_rows = rows_total - gb * block_rows   # may be <= 0 (fully masked dup)
        carry = read_acc()
        if n_full_chunks > 0:
            def body(ci, carry):
                start = pl.multiple_of(ci * _CHUNK_ROWS, _CHUNK_ROWS)
                return fold_masked(load_chunk(start, _CHUNK_ROWS), start,
                                   valid_rows, carry)
            carry = lax.fori_loop(0, n_full_chunks, body, carry,
                                  unroll=max(1, min(4, n_full_chunks)))
        if tail_rows > 0:
            start = n_full_chunks * _CHUNK_ROWS
            carry = fold_masked(load_chunk(start, tail_rows), start, valid_rows, carry)
        write_acc(carry)

    if not needs_masked:
        run_plain()
    else:
        gb = c * blocks_per_core + i
        is_full = gb < n_full_blocks

        @pl.when(is_full)
        def _():
            run_plain()

        @pl.when(jnp.logical_not(is_full))
        def _():
            run_masked()


def _partial_stats(x2d, *, block_bytes=_TARGET_BLOCK_BYTES):
    """Pallas reduction over a (rows, 128) slab.

    Returns a (N_CORES, 24, 128) f32 array: rows 0:8 partial mins, 8:16 partial
    maxes, 16:24 partial sums (per core), to be fully reduced by the caller.
    """
    rows, cols = x2d.shape
    assert cols == _LANES
    itemsize = jnp.dtype(x2d.dtype).itemsize

    # Byte-budgeted block, rounded to a multiple of the chunk size.
    budget_rows = max(_CHUNK_ROWS,
                      (block_bytes // (_LANES * itemsize)) // _CHUNK_ROWS * _CHUNK_ROWS)
    block_rows = rows if rows <= budget_rows else budget_rows

    n_blocks = pl.cdiv(rows, block_rows)
    blocks_per_core = pl.cdiv(n_blocks, _N_CORES)
    n_full_blocks = rows // block_rows
    needs_masked = (rows % block_rows != 0) or (blocks_per_core * _N_CORES != n_blocks)

    kernel = functools.partial(
        _stats_kernel,
        rows_total=rows, block_rows=block_rows, blocks_per_core=blocks_per_core,
        n_full_blocks=n_full_blocks, needs_masked=needs_masked)

    def in_map(c, i):
        # Clamp so duplicate iterations (odd block count) stay in bounds; the
        # kernel masks their contribution to zero.
        return (jnp.minimum(c * blocks_per_core + i, n_blocks - 1), 0)

    return pl.pallas_call(
        kernel,
        out_shape=jax.ShapeDtypeStruct((_N_CORES, 3 * _SUB, _LANES), jnp.float32),
        grid_spec=pltpu.PrefetchScalarGridSpec(
            num_scalar_prefetch=0,
            grid=(_N_CORES, blocks_per_core),
            in_specs=[pl.BlockSpec((block_rows, _LANES), in_map)],
            out_specs=pl.BlockSpec((None, 3 * _SUB, _LANES), lambda c, i: (c, 0, 0)),
        ),
        compiler_params=pltpu.CompilerParams(
            dimension_semantics=("parallel", "arbitrary"),
            vmem_limit_bytes=_VMEM_LIMIT_BYTES,
        ),
    )(x2d)


@functools.partial(jax.jit, static_argnames=("block_bytes",))
def _compute_stats(x, block_bytes=_TARGET_BLOCK_BYTES):
    """Global (min, mean, max); bulk reduced in Pallas, tiny tail in JAX."""
    total = x.size
    flat = jnp.ravel(x)
    g = _min_sublanes(x.dtype)
    head_rows = (total // _LANES) // g * g
    head_elems = head_rows * _LANES

    mins, maxs, sums = [], [], []
    if head_rows > 0:
        head = flat if head_elems == total else flat[:head_elems]
        acc = _partial_stats(head.reshape(head_rows, _LANES), block_bytes=block_bytes)
        mins.append(jnp.min(acc[:, 0:_SUB]))
        maxs.append(jnp.max(acc[:, _SUB:2 * _SUB]))
        sums.append(jnp.sum(acc[:, 2 * _SUB:3 * _SUB]))
    if head_elems < total:
        tail = flat[head_elems:].astype(jnp.float32)
        mins.append(jnp.min(tail))
        maxs.append(jnp.max(tail))
        sums.append(jnp.sum(tail))

    x_min = functools.reduce(jnp.minimum, mins)
    x_max = functools.reduce(jnp.maximum, maxs)
    x_mean = functools.reduce(jnp.add, sums) / jnp.float32(total)
    return x_min, x_mean, x_max


def print_stats(x):
    """Pallas-backed equivalent of PrintStats.forward."""
    x_min, x_mean, x_max = _compute_stats(x)
    # Single host sync fetching all three scalars at once.
    # TODO(synk): the print itself is host-side (no in-kernel equivalent), as in PyTorch.
    mn, me, mx = jax.device_get((x_min, x_mean, x_max))
    print('min: ', mn, ', mean: ', me, ', max: ', mx)
    return x


if __name__ == "__main__":
    key = jax.random.PRNGKey(0)
    x = jax.random.normal(key, (2, 4, 16, 16), dtype=jnp.float32)  # NCHW

    y = print_stats(x)
    y = jax.block_until_ready(y)

    # identity semantics
    assert y.shape == x.shape and y.dtype == x.dtype
    assert bool(jnp.all(y == x))

    # stats match pure-JAX reference
    x_min, x_mean, x_max = jax.block_until_ready(_compute_stats(x))
    assert jnp.allclose(x_min, jnp.min(x))
    assert jnp.allclose(x_max, jnp.max(x))
    assert jnp.allclose(x_mean, jnp.mean(x), atol=1e-5)

    # extra coverage: ragged total (JAX tail), multi-block grid with a masked
    # last block + duplicated (clamped) block for an odd block count (forced
    # via a tiny block budget), and the single-block path with an in-block tail.
    x2 = jax.random.normal(jax.random.PRNGKey(1), (3, 5, 37, 41), dtype=jnp.float32)
    for bb in (_TARGET_BLOCK_BYTES, 32 * 1024):
        m_min, m_mean, m_max = jax.block_until_ready(
            _compute_stats(x2, block_bytes=bb))
        assert jnp.allclose(m_min, jnp.min(x2))
        assert jnp.allclose(m_max, jnp.max(x2))
        assert jnp.allclose(m_mean, jnp.mean(x2), atol=1e-5)

    # bf16 path (per-chunk cast inside the kernel)
    x3 = jax.random.normal(jax.random.PRNGKey(2), (4, 8, 64), dtype=jnp.bfloat16)
    b_min, b_mean, b_max = jax.block_until_ready(_compute_stats(x3))
    x3f = x3.astype(jnp.float32)
    assert jnp.allclose(b_min, jnp.min(x3f))
    assert jnp.allclose(b_max, jnp.max(x3f))
    assert jnp.allclose(b_mean, jnp.mean(x3f), atol=1e-5)

    print("KERNEL_OK")
</pallas_src>

<mosaic_0001>
module attributes {stable_mosaic.version = 11 : i64} {
  func.func @_stats_kernel(%arg0: i32, %arg1: i32, %arg2: memref<16x128xf32, #tpu.memory_space<vmem>>, %arg3: memref<1x24x128xf32, #tpu.memory_space<vmem>>) attributes {dimension_semantics = [#tpu.dimension_semantics<parallel>, #tpu.dimension_semantics<arbitrary>], iteration_bounds = array<i64: 2, 1>, scalar_prefetch = 0 : i64, scratch_operands = 0 : i64, tpu.core_type = #tpu.core_type<tc>, window_params = [{transform_indices = @transform_0, window_bounds = array<i64: 16, 128>}, {transform_indices = @transform_1, window_bounds = array<i64: 1, 24, 128>}]} {
    %c0_i32 = arith.constant 0 : i32
    %0 = arith.cmpi eq, %arg1, %c0_i32 : i32
    %1 = arith.extui %0 : i1 to i32
    %c0_i32_0 = arith.constant 0 : i32
    %2 = arith.cmpi ne, %1, %c0_i32_0 : i32
    scf.if %2 {
      %cst = arith.constant 0x7F800000 : f32
      %11 = vector.broadcast %cst : f32 to vector<8x128xf32>
      %c0 = arith.constant 0 : index
      %c0_4 = arith.constant 0 : index
      %c0_5 = arith.constant 0 : index
      %12 = vector.load %arg3[%c0, %c0_4, %c0_5] : memref<1x24x128xf32, #tpu.memory_space<vmem>>, vector<1x8x128xf32>
      %13 = vector.shape_cast %12 : vector<1x8x128xf32> to vector<8x128xf32>
      %14 = vector.shape_cast %11 : vector<8x128xf32> to vector<1x8x128xf32>
      tpu.vector_store %arg3[%c0, %c0_4, %c0_5], %14 {strides = array<i32>} : memref<1x24x128xf32, #tpu.memory_space<vmem>>, vector<1x8x128xf32>,
      %cst_6 = arith.constant 0xFF800000 : f32
      %15 = vector.broadcast %cst_6 : f32 to vector<8x128xf32>
      %c0_7 = arith.constant 0 : index
      %c8 = arith.constant 8 : index
      %c0_8 = arith.constant 0 : index
      %16 = vector.load %arg3[%c0_7, %c8, %c0_8] : memref<1x24x128xf32, #tpu.memory_space<vmem>>, vector<1x8x128xf32>
      %17 = vector.shape_cast %16 : vector<1x8x128xf32> to vector<8x128xf32>
      %18 = vector.shape_cast %15 : vector<8x128xf32> to vector<1x8x128xf32>
      tpu.vector_store %arg3[%c0_7, %c8, %c0_8], %18 {strides = array<i32>} : memref<1x24x128xf32, #tpu.memory_space<vmem>>, vector<1x8x128xf32>,
      %cst_9 = arith.constant 0.000000e+00 : f32
      %19 = vector.broadcast %cst_9 : f32 to vector<8x128xf32>
      %c0_10 = arith.constant 0 : index
      %c16 = arith.constant 16 : index
      %c0_11 = arith.constant 0 : index
      %20 = vector.load %arg3[%c0_10, %c16, %c0_11] : memref<1x24x128xf32, #tpu.memory_space<vmem>>, vector<1x8x128xf32>
      %21 = vector.shape_cast %20 : vector<1x8x128xf32> to vector<8x128xf32>
      %22 = vector.shape_cast %19 : vector<8x128xf32> to vector<1x8x128xf32>
      tpu.vector_store %arg3[%c0_10, %c16, %c0_11], %22 {strides = array<i32>} : memref<1x24x128xf32, #tpu.memory_space<vmem>>, vector<1x8x128xf32>,
    } else {
    }
    %c1_i32 = arith.constant 1 : i32
    %3 = arith.muli %arg0, %c1_i32 : i32
    %4 = arith.addi %3, %arg1 : i32
    %c1_i32_1 = arith.constant 1 : i32
    %5 = arith.cmpi slt, %4, %c1_i32_1 : i32
    %6 = arith.extui %5 : i1 to i32
    %c0_i32_2 = arith.constant 0 : i32
    %7 = arith.cmpi ne, %6, %c0_i32_2 : i32
    scf.if %7 {
      %c0 = arith.constant 0 : index
      %c0_4 = arith.constant 0 : index
      %c0_5 = arith.constant 0 : index
      %11 = vector.load %arg3[%c0, %c0_4, %c0_5] : memref<1x24x128xf32, #tpu.memory_space<vmem>>, vector<1x8x128xf32>
      %12 = vector.shape_cast %11 : vector<1x8x128xf32> to vector<8x128xf32>
      %c0_6 = arith.constant 0 : index
      %c8 = arith.constant 8 : index
      %c0_7 = arith.constant 0 : index
      %13 = vector.load %arg3[%c0_6, %c8, %c0_7] : memref<1x24x128xf32, #tpu.memory_space<vmem>>, vector<1x8x128xf32>
      %14 = vector.shape_cast %13 : vector<1x8x128xf32> to vector<8x128xf32>
      %c0_8 = arith.constant 0 : index
      %c16 = arith.constant 16 : index
      %c0_9 = arith.constant 0 : index
      %15 = vector.load %arg3[%c0_8, %c16, %c0_9] : memref<1x24x128xf32, #tpu.memory_space<vmem>>, vector<1x8x128xf32>
      %16 = vector.shape_cast %15 : vector<1x8x128xf32> to vector<8x128xf32>
      %c0_10 = arith.constant 0 : index
      %c0_11 = arith.constant 0 : index
      %17 = vector.load %arg2[%c0_10, %c0_11] : memref<16x128xf32, #tpu.memory_space<vmem>>, vector<16x128xf32>
      %18 = vector.shape_cast %17 : vector<16x128xf32> to vector<2x8x128xf32>
      %cst = arith.constant dense<0x7F800000> : vector<8x128xf32>
      %19 = vector.multi_reduction <minimumf>, %18, %cst [0] : vector<2x8x128xf32> to vector<8x128xf32>
      %20 = arith.minimumf %12, %19 : vector<8x128xf32>
      %cst_12 = arith.constant dense<0xFF800000> : vector<8x128xf32>
      %21 = vector.multi_reduction <maximumf>, %18, %cst_12 [0] : vector<2x8x128xf32> to vector<8x128xf32>
      %22 = arith.maximumf %14, %21 : vector<8x128xf32>
      %cst_13 = arith.constant dense<0.000000e+00> : vector<8x128xf32>
      %23 = vector.multi_reduction <add>, %18, %cst_13 [0] : vector<2x8x128xf32> to vector<8x128xf32>
      %24 = arith.addf %16, %23 : vector<8x128xf32>
      %c0_14 = arith.constant 0 : index
      %c0_15 = arith.constant 0 : index
      %c0_16 = arith.constant 0 : index
      %25 = vector.load %arg3[%c0_14, %c0_15, %c0_16] : memref<1x24x128xf32, #tpu.memory_space<vmem>>, vector<1x8x128xf32>
      %26 = vector.shape_cast %25 : vector<1x8x128xf32> to vector<8x128xf32>
      %27 = vector.shape_cast %20 : vector<8x128xf32> to vector<1x8x128xf32>
      tpu.vector_store %arg3[%c0_14, %c0_15, %c0_16], %27 {strides = array<i32>} : memref<1x24x128xf32, #tpu.memory_space<vmem>>, vector<1x8x128xf32>,
      %c0_17 = arith.constant 0 : index
      %c8_18 = arith.constant 8 : index
      %c0_19 = arith.constant 0 : index
      %28 = vector.load %arg3[%c0_17, %c8_18, %c0_19] : memref<1x24x128xf32, #tpu.memory_space<vmem>>, vector<1x8x128xf32>
      %29 = vector.shape_cast %28 : vector<1x8x128xf32> to vector<8x128xf32>
      %30 = vector.shape_cast %22 : vector<8x128xf32> to vector<1x8x128xf32>
      tpu.vector_store %arg3[%c0_17, %c8_18, %c0_19], %30 {strides = array<i32>} : memref<1x24x128xf32, #tpu.memory_space<vmem>>, vector<1x8x128xf32>,
      %c0_20 = arith.constant 0 : index
      %c16_21 = arith.constant 16 : index
      %c0_22 = arith.constant 0 : index
      %31 = vector.load %arg3[%c0_20, %c16_21, %c0_22] : memref<1x24x128xf32, #tpu.memory_space<vmem>>, vector<1x8x128xf32>
      %32 = vector.shape_cast %31 : vector<1x8x128xf32> to vector<8x128xf32>
      %33 = vector.shape_cast %24 : vector<8x128xf32> to vector<1x8x128xf32>
      tpu.vector_store %arg3[%c0_20, %c16_21, %c0_22], %33 {strides = array<i32>} : memref<1x24x128xf32, #tpu.memory_space<vmem>>, vector<1x8x128xf32>,
    } else {
    }
    %true = arith.constant true
    %8 = arith.xori %5, %true : i1
    %9 = arith.extui %8 : i1 to i32
    %c0_i32_3 = arith.constant 0 : i32
    %10 = arith.cmpi ne, %9, %c0_i32_3 : i32
    scf.if %10 {
      %c1_i32_4 = arith.constant 1 : i32
      %11 = arith.muli %arg0, %c1_i32_4 : i32
      %12 = arith.addi %11, %arg1 : i32
      %c16_i32 = arith.constant 16 : i32
      %13 = arith.muli %12, %c16_i32 : i32
      %c16_i32_5 = arith.constant 16 : i32
      %14 = arith.subi %c16_i32_5, %13 : i32
      %c0 = arith.constant 0 : index
      %c0_6 = arith.constant 0 : index
      %c0_7 = arith.constant 0 : index
      %15 = vector.load %arg3[%c0, %c0_6, %c0_7] : memref<1x24x128xf32, #tpu.memory_space<vmem>>, vector<1x8x128xf32>
      %16 = vector.shape_cast %15 : vector<1x8x128xf32> to vector<8x128xf32>
      %c0_8 = arith.constant 0 : index
      %c8 = arith.constant 8 : index
      %c0_9 = arith.constant 0 : index
      %17 = vector.load %arg3[%c0_8, %c8, %c0_9] : memref<1x24x128xf32, #tpu.memory_space<vmem>>, vector<1x8x128xf32>
      %18 = vector.shape_cast %17 : vector<1x8x128xf32> to vector<8x128xf32>
      %c0_10 = arith.constant 0 : index
      %c16 = arith.constant 16 : index
      %c0_11 = arith.constant 0 : index
      %19 = vector.load %arg3[%c0_10, %c16, %c0_11] : memref<1x24x128xf32, #tpu.memory_space<vmem>>, vector<1x8x128xf32>
      %20 = vector.shape_cast %19 : vector<1x8x128xf32> to vector<8x128xf32>
      %c0_12 = arith.constant 0 : index
      %c0_13 = arith.constant 0 : index
      %21 = vector.load %arg2[%c0_12, %c0_13] : memref<16x128xf32, #tpu.memory_space<vmem>>, vector<16x128xf32>
      %22 = vector.shape_cast %21 : vector<16x128xf32> to vector<2x8x128xf32>
      %23 = tpu.iota {dimensions = array<i32: 0>} : vector<2x8x128xi32>
      %24 = tpu.iota {dimensions = array<i32: 1>} : vector<2x8x128xi32>
      %c8_i32 = arith.constant 8 : i32
      %25 = vector.broadcast %c8_i32 : i32 to vector<2x8x128xi32>
      %26 = arith.muli %23, %25 : vector<2x8x128xi32>
      %c0_i32_14 = arith.constant 0 : i32
      %27 = vector.broadcast %c0_i32_14 : i32 to vector<2x8x128xi32>
      %28 = arith.addi %27, %26 : vector<2x8x128xi32>
      %29 = arith.addi %28, %24 : vector<2x8x128xi32>
      %30 = vector.broadcast %14 : i32 to vector<2x8x128xi32>
      %31 = arith.cmpi slt, %29, %30 : vector<2x8x128xi32>
      %cst = arith.constant 0x7F800000 : f32
      %32 = vector.broadcast %cst : f32 to vector<2x8x128xf32>
      %33 = arith.select %31, %22, %32 : vector<2x8x128xi1>, vector<2x8x128xf32>
      %cst_15 = arith.constant dense<0x7F800000> : vector<8x128xf32>
      %34 = vector.multi_reduction <minimumf>, %33, %cst_15 [0] : vector<2x8x128xf32> to vector<8x128xf32>
      %35 = arith.minimumf %16, %34 : vector<8x128xf32>
      %cst_16 = arith.constant 0xFF800000 : f32
      %36 = vector.broadcast %cst_16 : f32 to vector<2x8x128xf32>
      %37 = arith.select %31, %22, %36 : vector<2x8x128xi1>, vector<2x8x128xf32>
      %cst_17 = arith.constant dense<0xFF800000> : vector<8x128xf32>
      %38 = vector.multi_reduction <maximumf>, %37, %cst_17 [0] : vector<2x8x128xf32> to vector<8x128xf32>
      %39 = arith.maximumf %18, %38 : vector<8x128xf32>
      %cst_18 = arith.constant 0.000000e+00 : f32
      %40 = vector.broadcast %cst_18 : f32 to vector<2x8x128xf32>
      %41 = arith.select %31, %22, %40 : vector<2x8x128xi1>, vector<2x8x128xf32>
      %cst_19 = arith.constant dense<0.000000e+00> : vector<8x128xf32>
      %42 = vector.multi_reduction <add>, %41, %cst_19 [0] : vector<2x8x128xf32> to vector<8x128xf32>
      %43 = arith.addf %20, %42 : vector<8x128xf32>
      %c0_20 = arith.constant 0 : index
      %c0_21 = arith.constant 0 : index
      %c0_22 = arith.constant 0 : index
      %44 = vector.load %arg3[%c0_20, %c0_21, %c0_22] : memref<1x24x128xf32, #tpu.memory_space<vmem>>, vector<1x8x128xf32>
      %45 = vector.shape_cast %44 : vector<1x8x128xf32> to vector<8x128xf32>
      %46 = vector.shape_cast %35 : vector<8x128xf32> to vector<1x8x128xf32>
      tpu.vector_store %arg3[%c0_20, %c0_21, %c0_22], %46 {strides = array<i32>} : memref<1x24x128xf32, #tpu.memory_space<vmem>>, vector<1x8x128xf32>,
      %c0_23 = arith.constant 0 : index
      %c8_24 = arith.constant 8 : index
      %c0_25 = arith.constant 0 : index
      %47 = vector.load %arg3[%c0_23, %c8_24, %c0_25] : memref<1x24x128xf32, #tpu.memory_space<vmem>>, vector<1x8x128xf32>
      %48 = vector.shape_cast %47 : vector<1x8x128xf32> to vector<8x128xf32>
      %49 = vector.shape_cast %39 : vector<8x128xf32> to vector<1x8x128xf32>
      tpu.vector_store %arg3[%c0_23, %c8_24, %c0_25], %49 {strides = array<i32>} : memref<1x24x128xf32, #tpu.memory_space<vmem>>, vector<1x8x128xf32>,
      %c0_26 = arith.constant 0 : index
      %c16_27 = arith.constant 16 : index
      %c0_28 = arith.constant 0 : index
      %50 = vector.load %arg3[%c0_26, %c16_27, %c0_28] : memref<1x24x128xf32, #tpu.memory_space<vmem>>, vector<1x8x128xf32>
      %51 = vector.shape_cast %50 : vector<1x8x128xf32> to vector<8x128xf32>
      %52 = vector.shape_cast %43 : vector<8x128xf32> to vector<1x8x128xf32>
      tpu.vector_store %arg3[%c0_26, %c16_27, %c0_28], %52 {strides = array<i32>} : memref<1x24x128xf32, #tpu.memory_space<vmem>>, vector<1x8x128xf32>,
    } else {
    }
    return
  }
  func.func @transform_0(%arg0: i32, %arg1: i32) -> (i32, i32) {
    %c1_i32 = arith.constant 1 : i32
    %0 = arith.muli %arg0, %c1_i32 : i32
    %1 = arith.addi %0, %arg1 : i32
    %c0_i32 = arith.constant 0 : i32
    %2 = arith.minsi %1, %c0_i32 : i32
    %c0_i32_0 = arith.constant 0 : i32
    %c0_i32_1 = arith.constant 0 : i32
    return %2, %c0_i32_0 : i32, i32
  }
  func.func @transform_1(%arg0: i32, %arg1: i32) -> (i32, i32, i32) {
    %c0_i32 = arith.constant 0 : i32
    %c0_i32_0 = arith.constant 0 : i32
    %c0_i32_1 = arith.constant 0 : i32
    return %arg0, %c0_i32, %c0_i32_0 : i32, i32, i32
  }
}

</mosaic_0001>

<bundles_post_ra>
// kernel: _compute_stats.1
= control target key start
LH: loop header
LB: loop body
LE: loop exit
PB: predicated region body
PF: predicated region fallthrough
CT: control target
= control target key end

     0   :  { %s351_s6 = smov 0   ;;  %s353_s7 = smov 0   ;;  %s413_s0 = inlined_call_operand.vmem [shape: f32[16,128], index: 0, kind: input, shape index: {}]   ;;  %s414_s1 = inlined_call_operand.vmem [shape: f32[2,24,128], index: 1, kind: output, shape index: {}]  }
   0x1   :  { %s355_s8 = smov 0  }
   0x2 LB: > { %s23_s9 = sadd.s32 1, %s332_s7  ;;  %p277_p0 = scmp.ge.s32.totalorder %s336_s8, 1  ;;  %s336_s8 = sphi %s355_s8, %s11_s8   ;;  %s332_s7 = sphi %s353_s7, %s416_s7   ;;  %s328_s6 = sphi %s351_s6, %s415_s6  }
   0x3   : > { %p25_p1 = scmp.ge.s32.totalorder %s23_s9, 2  ;;  %p112_p2 = scmp.lt.s32.totalorder %s336_s8, 3 }
   0x5   : > { %s418_s9 = smov (%p25_p1, %s23_s9), 0  ;;  %p113_p3 = pnand %p277_p0, %p112_p2 }
   0x6   : > { %p136_p4 = scmp.lt.s32.totalorder (!%p113_p3), %s328_s6, 0  ;;  %p147_p5 = scmp.lt.s32.totalorder (!%p113_p3), %s328_s6, 1  ;;  %v338_v0 = vmov (!%p113_p3), inf   ;;  %v339_v1 = vmov (!%p113_p3), -inf   ;;  %v340_v2 = vmov (!%p113_p3), 0.0  }
   0x7   : > { %116 = sbr.rel (%p113_p3) target bundleno = 46 (0x2e), region = 24  ;;  %p281_p7 = scmp.ge.s32.totalorder (!%p113_p3), %s328_s6, 1 }
   0xe   : > { %s137_s10 = scalar_select %p136_p4, %s328_s6, 0 }
   0xf   : > { %s148_s11 = scalar_select %p147_p5, %s328_s6, 1 }
  0x10   : > { %s278_s12 = sshll.u32 %s137_s10, 1  ;;  %163 = sbr.rel (%p281_p7) target bundleno = 32 (0x20), region = 32 }
  0x11   : > { %p139_p6 = scmp.lt.s32.totalorder %s278_s12, 1  ;;  %s286_s13 = smul.u32 24, %s148_s11 }
  0x13   : > { %s420_s12 = smov (!%p139_p6, %s278_s12), 1  ;;  %s380_s16 = scalar_lea.vmem %s414_s1, %s286_s13 }
  0x14   : > { %s279_s17 = sshll.u32 %s420_s12, 3  ;;  %156 = vst [vmem:[%s380_s16] sm:$0xff] %v338_v0  ;;  %157 = vst [vmem:[%s380_s16 + $0x8] sm:$0xff] %v339_v1 }
  0x15   : > { %158 = vst [vmem:[%s380_s16 + $0x10] sm:$0xff] %v340_v2  ;;  %s142_s20 = scalar_lea.vmem %s413_s0, %s279_s17 }
  0x16   : > { %v167_v4 = vld [vmem:[%s142_s20] sm:$0xff] (!%p281_p7)  ;;  %v168_v5 = vld [vmem:[%s142_s20 + $0x8] sm:$0xff] (!%p281_p7) }
  0x17   : > { %v169_v6 = vmin.f32 %v167_v4, %v168_v5  ;;  %v171_v8 = vmax.f32 %v167_v4, %v168_v5  ;;  %v173_v10 = vadd.f32 %v168_v5, %v167_v4 }
  0x1b   : > { %v164_v3 = vld [vmem:[%s380_s16] sm:$0xff]  ;;  %v165_v7 = vld [vmem:[%s380_s16 + $0x8] sm:$0xff] }
  0x1c   : > { %v166_v9 = vld [vmem:[%s380_s16 + $0x10] sm:$0xff]  ;;  %v170_v11 = vmin.f32 %v164_v3, %v169_v6  ;;  %v172_v12 = vmax.f32 %v165_v7, %v171_v8 }
  0x1d   : > { %v174_v13 = vadd.f32 %v173_v10, %v166_v9 }
  0x1e   : > { %175 = vst [vmem:[%s380_s16] sm:$0xff] %v170_v11  ;;  %176 = vst [vmem:[%s380_s16 + $0x8] sm:$0xff] %v172_v12 }
  0x1f   : > { %177 = vst [vmem:[%s380_s16 + $0x10] sm:$0xff] %v174_v13 }
  0x20 PF: > { %181 = sbr.rel (%p147_p5) target bundleno = 46 (0x2e), region = 36  ;;  %s283_s21 = sshll.u32 (!%p147_p5), %s328_s6, 4  ;;  %v189_v14 = vlaneseq (!%p147_p5)  ;;  %v187_v15 = vld [vmem:[%s142_s20] sm:$0xff] (!%p147_p5)  ;;  %v188_v18 = vld [vmem:[%s142_s20 + $0x8] sm:$0xff] (!%p147_p5) }
  0x21   : > { %s183_s22 = ssub.s32 (!%p147_p5), 16, %s283_s21 }
  0x22   : > { %v190_v16 = vshrl.u32 (!%p147_p5), %v189_v14, 7  ;;  %v192_v17 = vstv (!%p147_p5), %s183_s22 }
  0x24   : > { %v191_v19 = vadd.s32 (!%p147_p5), 8, %v190_v16  ;;  %vm193_vm0 = vcmp.lt.s32.totalorder (!%p147_p5), %v190_v16, %v192_v17 }
  0x25   : > { %v195_v20 = vsel (!%p147_p5), %vm193_vm0, %v187_v15, inf  ;;  %v199_v21 = vsel (!%p147_p5), %vm193_vm0, %v187_v15, -inf  ;;  %v203_v22 = vsel (!%p147_p5), %vm193_vm0, %v187_v15, 0.0  ;;  %v184_v23 = vld [vmem:[%s380_s16] sm:$0xff] (!%p147_p5)  ;;  %v185_v25 = vld [vmem:[%s380_s16 + $0x8] sm:$0xff] (!%p147_p5) }
  0x26   : > { %vm194_vm1 = vcmp.lt.s32.totalorder (!%p147_p5), %v191_v19, %v192_v17  ;;  %v186_v27 = vld [vmem:[%s380_s16 + $0x10] sm:$0xff] (!%p147_p5) }
  0x27   : > { %v196_v24 = vsel %vm194_vm1, %v188_v18, inf  ;;  %v200_v26 = vsel %vm194_vm1, %v188_v18, -inf  ;;  %v204_v28 = vsel %vm194_vm1, %v188_v18, 0.0 }
  0x28   : > { %v197_v29 = vmin.f32 %v195_v20, %v196_v24  ;;  %v201_v30 = vmax.f32 %v199_v21, %v200_v26  ;;  %v205_v31 = vadd.f32 %v204_v28, %v203_v22 }
  0x2a   : > { %v198_v32 = vmin.f32 %v184_v23, %v197_v29  ;;  %v202_v33 = vmax.f32 %v185_v25, %v201_v30  ;;  %v206_v34 = vadd.f32 %v205_v31, %v186_v27 }
  0x2c   : > { %207 = vst [vmem:[%s380_s16] sm:$0xff] %v198_v32  ;;  %208 = vst [vmem:[%s380_s16 + $0x8] sm:$0xff] %v202_v33 }
  0x2d   : > { %209 = vst [vmem:[%s380_s16 + $0x10] sm:$0xff] %v206_v34 }
  0x2e PF: > { %s11_s8 = sadd.s32 1, %s336_s8   ;;  %s415_s6 = smov %s332_s7 }
  0x2f   : > { %p8_p8 = scmp.ge.s32.totalorder %s11_s8, 4   ;;  %s416_s7 = smov %s418_s9 }
  0x31   :  { %10 = sbr.rel (!%p8_p8) target bundleno = 2 (0x2), region = 66 }

</bundles_post_ra>
